<compile_context>
chip_gen: v6e
topology: v6e:2x2x1
jax: 0.10.0
libtpu: 0.0.40
codegen_flags: <defaults>
</compile_context>

<pallas_src>
import functools
import math

import jax
import jax.numpy as jnp
from jax.experimental import pallas as pl
from jax.experimental.pallas import tpu as pltpu


# ----------------------------- helpers -----------------------------

def _pick_row_block(n, target=512):
    """Largest block <= target, multiple of 16 (bf16 sublane packing, then 8),
    that divides n; else n."""
    if n <= target:
        return n
    for mult in (16, 8):
        b = (target // mult) * mult
        while b >= mult:
            if n % b == 0:
                return b
            b -= mult
    return n


def _pick_lane_block(n, target=512):
    """Largest block <= target, multiple of 128, that divides n; else n."""
    if n <= target:
        return n
    b = (target // 128) * 128
    while b >= 128:
        if n % b == 0:
            return b
        b -= 128
    return n


_VMEM_LIMIT = 64 * 1024 * 1024  # explicit scoped-VMEM limit (v5e default: 16 MiB)


def _cparams(*semantics):
    return pltpu.CompilerParams(dimension_semantics=semantics,
                                vmem_limit_bytes=_VMEM_LIMIT)


# ----------------------------- row-parallel kernels -----------------------------

def _linear_kernel(x_ref, w_ref, b_ref, o_ref):
    # x: [bn, Din] (f32), w: [Din, Dout] (bf16), b: [1, Dout] (f32)
    y = jnp.dot(x_ref[...].astype(jnp.bfloat16), w_ref[...].astype(jnp.bfloat16),
                preferred_element_type=jnp.float32)
    y = y + b_ref[...].astype(jnp.float32)
    o_ref[...] = y.astype(o_ref.dtype)


def linear(x, w, b, block_rows=512):
    """Row-tiled x @ w + b.  x: [N, Din] f32, w: [Din, Dout] bf16, b: [Dout] f32."""
    N, Din = x.shape
    Dout = w.shape[1]
    bn = _pick_row_block(N, block_rows)
    return pl.pallas_call(
        _linear_kernel,
        out_shape=jax.ShapeDtypeStruct((N, Dout), x.dtype),
        grid=(N // bn,),
        in_specs=[
            pl.BlockSpec((bn, Din), lambda i: (i, 0)),
            pl.BlockSpec((Din, Dout), lambda i: (0, 0)),
            pl.BlockSpec((1, Dout), lambda i: (0, 0)),
        ],
        out_specs=pl.BlockSpec((bn, Dout), lambda i: (i, 0)),
        compiler_params=_cparams("parallel"),
    )(x, w, b.reshape(1, Dout))


def _proj_add_ln_kernel(a_ref, w_ref, b_ref, r_ref, g_ref, beta_ref, o_ref, *, eps):
    # fused: (a @ w + b) + residual, then LayerNorm over last dim (f32 stats)
    y = jnp.dot(a_ref[...].astype(jnp.bfloat16), w_ref[...].astype(jnp.bfloat16),
                preferred_element_type=jnp.float32)
    y = y + b_ref[...].astype(jnp.float32) + r_ref[...].astype(jnp.float32)
    mu = jnp.mean(y, axis=-1, keepdims=True)
    var = jnp.mean((y - mu) ** 2, axis=-1, keepdims=True)
    yn = (y - mu) * jax.lax.rsqrt(var + eps)
    o_ref[...] = (yn * g_ref[...] + beta_ref[...]).astype(o_ref.dtype)


def proj_add_layernorm(a, w, b, residual, gamma, beta, eps=1e-5, block_rows=512):
    """Fused output-projection + residual add + LayerNorm.  a/residual: [N, D]."""
    N, Din = a.shape
    Dout = w.shape[1]
    bn = _pick_row_block(N, block_rows)
    return pl.pallas_call(
        functools.partial(_proj_add_ln_kernel, eps=eps),
        out_shape=jax.ShapeDtypeStruct((N, Dout), a.dtype),
        grid=(N // bn,),
        in_specs=[
            pl.BlockSpec((bn, Din), lambda i: (i, 0)),
            pl.BlockSpec((Din, Dout), lambda i: (0, 0)),
            pl.BlockSpec((1, Dout), lambda i: (0, 0)),
            pl.BlockSpec((bn, Dout), lambda i: (i, 0)),
            pl.BlockSpec((1, Dout), lambda i: (0, 0)),
            pl.BlockSpec((1, Dout), lambda i: (0, 0)),
        ],
        out_specs=pl.BlockSpec((bn, Dout), lambda i: (i, 0)),
        compiler_params=_cparams("parallel"),
    )(a, w, b.reshape(1, Dout), residual, gamma.reshape(1, Dout), beta.reshape(1, Dout))


def _ffn_ln_kernel(x_ref, w1_ref, b1_ref, w2_ref, b2_ref, g_ref, beta_ref,
                   o_ref, acc_ref, *, eps):
    # dff-tiled FFN: relu(x@W1+b1)@W2 accumulated over dff tiles, then
    # (+b2 + residual(x)) and LayerNorm on the last tile.
    j = pl.program_id(1)

    @pl.when(j == 0)
    def _():
        acc_ref[...] = jnp.zeros_like(acc_ref)

    x = x_ref[...]
    h = jnp.dot(x.astype(jnp.bfloat16), w1_ref[...].astype(jnp.bfloat16),
                preferred_element_type=jnp.float32) + b1_ref[...].astype(jnp.float32)
    h = jnp.maximum(h, 0.0)
    acc_ref[...] += jnp.dot(h.astype(jnp.bfloat16), w2_ref[...].astype(jnp.bfloat16),
                            preferred_element_type=jnp.float32)

    @pl.when(j == pl.num_programs(1) - 1)
    def _():
        y = acc_ref[...] + b2_ref[...].astype(jnp.float32) + x.astype(jnp.float32)
        mu = jnp.mean(y, axis=-1, keepdims=True)
        var = jnp.mean((y - mu) ** 2, axis=-1, keepdims=True)
        yn = (y - mu) * jax.lax.rsqrt(var + eps)
        o_ref[...] = (yn * g_ref[...] + beta_ref[...]).astype(o_ref.dtype)


def ffn_add_layernorm(x, w1, b1, w2, b2, gamma, beta, eps=1e-5,
                      block_rows=256, block_dff=512):
    """Fused position-wise FFN + residual + LayerNorm, tiled over rows and dff."""
    N, D = x.shape
    dff = w1.shape[1]
    bn = _pick_row_block(N, block_rows)
    bd = _pick_lane_block(dff, block_dff)
    return pl.pallas_call(
        functools.partial(_ffn_ln_kernel, eps=eps),
        out_shape=jax.ShapeDtypeStruct((N, D), x.dtype),
        grid=(N // bn, dff // bd),
        in_specs=[
            pl.BlockSpec((bn, D), lambda i, j: (i, 0)),
            pl.BlockSpec((D, bd), lambda i, j: (0, j)),
            pl.BlockSpec((1, bd), lambda i, j: (0, j)),
            pl.BlockSpec((bd, D), lambda i, j: (j, 0)),
            pl.BlockSpec((1, D), lambda i, j: (0, 0)),
            pl.BlockSpec((1, D), lambda i, j: (0, 0)),
            pl.BlockSpec((1, D), lambda i, j: (0, 0)),
        ],
        out_specs=pl.BlockSpec((bn, D), lambda i, j: (i, 0)),
        scratch_shapes=[pltpu.VMEM((bn, D), jnp.float32)],
        compiler_params=_cparams("parallel", "arbitrary"),
    )(x, w1, b1.reshape(1, dff), w2, b2.reshape(1, D),
      gamma.reshape(1, D), beta.reshape(1, D))


# ----------------------------- flash attention kernel -----------------------------

def _flash_attn_kernel(q_ref, k_ref, v_ref, pad_ref, o_ref,
                       m_sc, l_sc, acc_sc, *, scale, causal, tq, tk):
    """One (batch*head, q-tile) program, looping Sk tiles with online softmax.

    q_ref:   [1, tq, dh]     k_ref/v_ref: [1, tk, dh]
    pad_ref: [1, 1, tk]      additive key-padding mask (0 keep, -1e9 masked)
    """
    qi = pl.program_id(1)
    ki = pl.program_id(2)

    @pl.when(ki == 0)
    def _init():
        m_sc[...] = jnp.full_like(m_sc, -jnp.inf)
        l_sc[...] = jnp.zeros_like(l_sc)
        acc_sc[...] = jnp.zeros_like(acc_sc)

    def _compute():
        q = q_ref[0].astype(jnp.bfloat16)
        k = k_ref[0].astype(jnp.bfloat16)
        # q @ k^T as a contraction over dh (no explicit transpose of k)
        s = jax.lax.dot_general(q, k, (((1,), (1,)), ((), ())),
                                preferred_element_type=jnp.float32)
        s = s * scale + pad_ref[0].astype(jnp.float32)  # [1, tk] broadcasts over rows
        if causal:
            q_pos = qi * tq + jax.lax.broadcasted_iota(jnp.int32, (tq, tk), 0)
            k_pos = ki * tk + jax.lax.broadcasted_iota(jnp.int32, (tq, tk), 1)
            s = jnp.where(q_pos >= k_pos, s, -1e9)
        m_prev = m_sc[...]
        m_new = jnp.maximum(m_prev, jnp.max(s, axis=-1, keepdims=True))
        alpha = jnp.exp(m_prev - m_new)
        p = jnp.exp(s - m_new)
        l_sc[...] = alpha * l_sc[...] + jnp.sum(p, axis=-1, keepdims=True)
        acc_sc[...] = alpha * acc_sc[...] + jnp.dot(
            p.astype(jnp.bfloat16), v_ref[0].astype(jnp.bfloat16),
            preferred_element_type=jnp.float32)
        m_sc[...] = m_new

    if causal:
        # Skip key tiles that lie entirely above the causal diagonal.
        pl.when(ki * tk <= qi * tq + (tq - 1))(_compute)
    else:
        _compute()

    @pl.when(ki == pl.num_programs(2) - 1)
    def _finalize():
        o_ref[0] = (acc_sc[...] / l_sc[...]).astype(o_ref.dtype)


def flash_attention(q, k, v, key_pad, *, causal, tq_target=256, tk_target=512):
    """Flash-style multi-head attention.

    q:       [B*H, Sq, dh]
    k, v:    [B*H, Sk, dh]
    key_pad: [B, 1, Sk] additive key-padding mask (0 keep, -1e9 masked)
    Returns  [B*H, Sq, dh].
    """
    BH, Sq, dh = q.shape
    Sk = k.shape[1]
    B = key_pad.shape[0]
    H = BH // B
    scale = 1.0 / math.sqrt(dh)
    tq = _pick_row_block(Sq, tq_target)
    tk = _pick_lane_block(Sk, tk_target)   # multiple of 128 (or full Sk): pad-mask lane dim

    return pl.pallas_call(
        functools.partial(_flash_attn_kernel, scale=scale, causal=causal, tq=tq, tk=tk),
        out_shape=jax.ShapeDtypeStruct((BH, Sq, dh), q.dtype),
        grid=(BH, Sq // tq, Sk // tk),
        in_specs=[
            pl.BlockSpec((1, tq, dh), lambda b, i, j: (b, i, 0)),
            pl.BlockSpec((1, tk, dh), lambda b, i, j: (b, j, 0)),
            pl.BlockSpec((1, tk, dh), lambda b, i, j: (b, j, 0)),
            pl.BlockSpec((1, 1, tk), lambda b, i, j: (b // H, 0, j)),
        ],
        out_specs=pl.BlockSpec((1, tq, dh), lambda b, i, j: (b, i, 0)),
        scratch_shapes=[
            pltpu.VMEM((tq, 1), jnp.float32),   # running max m
            pltpu.VMEM((tq, 1), jnp.float32),   # running sum l
            pltpu.VMEM((tq, dh), jnp.float32),  # running acc
        ],
        compiler_params=_cparams("parallel", "parallel", "arbitrary"),
    )(q, k, v, key_pad)


# ----------------------------- model wrappers -----------------------------

def decoder_layer_forward(p, x2d, enc2d, enc_pad, dec_pad, B, St, Ss, H, D):
    """One post-LN decoder layer.  x2d: [B*St, D], enc2d: [B*Ss, D]."""
    dh = D // H

    # ---- masked (causal) self-attention ----
    sa = p["self_attn"]
    qkv = linear(x2d, sa["wqkv"], sa["bqkv"])                        # [N, 3D]
    qkv = qkv.reshape(B, St, 3, H, dh).transpose(2, 0, 3, 1, 4)      # [3, B, H, St, dh]
    q = qkv[0].reshape(B * H, St, dh)
    k = qkv[1].reshape(B * H, St, dh)
    v = qkv[2].reshape(B * H, St, dh)
    attn1 = flash_attention(q, k, v, dec_pad, causal=True)           # [BH, St, dh]
    attn1 = attn1.reshape(B, H, St, dh).transpose(0, 2, 1, 3).reshape(B * St, D)
    out1 = proj_add_layernorm(attn1, sa["wo"], sa["bo"], x2d, p["ln1_g"], p["ln1_b"])

    # ---- encoder-decoder (cross) attention ----
    ca = p["cross_attn"]
    qx = linear(out1, ca["wq"], ca["bq"])                            # [N, D]
    kv = linear(enc2d, ca["wkv"], ca["bkv"])                         # [Ne, 2D]
    q = qx.reshape(B, St, H, dh).transpose(0, 2, 1, 3).reshape(B * H, St, dh)
    kv = kv.reshape(B, Ss, 2, H, dh).transpose(2, 0, 3, 1, 4)        # [2, B, H, Ss, dh]
    k = kv[0].reshape(B * H, Ss, dh)
    v = kv[1].reshape(B * H, Ss, dh)
    attn2 = flash_attention(q, k, v, enc_pad, causal=False)
    attn2 = attn2.reshape(B, H, St, dh).transpose(0, 2, 1, 3).reshape(B * St, D)
    out2 = proj_add_layernorm(attn2, ca["wo"], ca["bo"], out1, p["ln2_g"], p["ln2_b"])

    # ---- position-wise FFN (fused, dff-tiled) ----
    out3 = ffn_add_layernorm(out2, p["ffn_w1"], p["ffn_b1"],
                             p["ffn_w2"], p["ffn_b2"],
                             p["ln3_g"], p["ln3_b"])
    return out3


def decoder_forward(params, x, enc_out, mask, look_ahead_mask):
    """Matches PyTorch Decoder.forward (stack of identical decoder layers).

    x:               [B, St, D] decoder input
    enc_out:         [B, Ss, D] encoder output
    mask:            additive encoder-key padding mask, any of [B,Ss]/[B,1,Ss]/[B,1,1,Ss]
                     (0 keep, -1e9 masked), used by cross-attention.
    look_ahead_mask: additive decoder-key padding mask (same shapes, over St); the
                     causal look-ahead component is generated inside the kernel.
    """
    B, St, D = x.shape
    Ss = enc_out.shape[1]
    H = params["n_heads"]
    enc_pad = jnp.reshape(mask, (B, 1, Ss)).astype(jnp.float32)
    dec_pad = jnp.reshape(look_ahead_mask, (B, 1, St)).astype(jnp.float32)

    out = x.reshape(B * St, D)
    enc = enc_out.reshape(B * Ss, D)
    for p in params["layers"]:
        out = decoder_layer_forward(p, out, enc, enc_pad, dec_pad, B, St, Ss, H, D)
    return out.reshape(B, St, D)


# ----------------------------- parameter init -----------------------------

def init_self_attn_params(key, D):
    ks = jax.random.split(key, 4)
    s = 0.02
    wq = jax.random.normal(ks[0], (D, D), jnp.float32) * s
    wk = jax.random.normal(ks[1], (D, D), jnp.float32) * s
    wv = jax.random.normal(ks[2], (D, D), jnp.float32) * s
    return {
        "wqkv": jnp.concatenate([wq, wk, wv], axis=1).astype(jnp.bfloat16),   # [D, 3D]
        "bqkv": jnp.zeros((3 * D,), jnp.float32),
        "wo": (jax.random.normal(ks[3], (D, D), jnp.float32) * s).astype(jnp.bfloat16),
        "bo": jnp.zeros((D,), jnp.float32),
    }


def init_cross_attn_params(key, D):
    ks = jax.random.split(key, 4)
    s = 0.02
    wk = jax.random.normal(ks[1], (D, D), jnp.float32) * s
    wv = jax.random.normal(ks[2], (D, D), jnp.float32) * s
    return {
        "wq": (jax.random.normal(ks[0], (D, D), jnp.float32) * s).astype(jnp.bfloat16),
        "bq": jnp.zeros((D,), jnp.float32),
        "wkv": jnp.concatenate([wk, wv], axis=1).astype(jnp.bfloat16),        # [D, 2D]
        "bkv": jnp.zeros((2 * D,), jnp.float32),
        "wo": (jax.random.normal(ks[3], (D, D), jnp.float32) * s).astype(jnp.bfloat16),
        "bo": jnp.zeros((D,), jnp.float32),
    }


def init_layer_params(key, D, dff):
    ks = jax.random.split(key, 4)
    s = 0.02
    return {
        "self_attn": init_self_attn_params(ks[0], D),
        "cross_attn": init_cross_attn_params(ks[1], D),
        "ffn_w1": (jax.random.normal(ks[2], (D, dff), jnp.float32) * s).astype(jnp.bfloat16),
        "ffn_b1": jnp.zeros((dff,), jnp.float32),
        "ffn_w2": (jax.random.normal(ks[3], (dff, D), jnp.float32) * s).astype(jnp.bfloat16),
        "ffn_b2": jnp.zeros((D,), jnp.float32),
        "ln1_g": jnp.ones((D,), jnp.float32), "ln1_b": jnp.zeros((D,), jnp.float32),
        "ln2_g": jnp.ones((D,), jnp.float32), "ln2_b": jnp.zeros((D,), jnp.float32),
        "ln3_g": jnp.ones((D,), jnp.float32), "ln3_b": jnp.zeros((D,), jnp.float32),
    }


def init_decoder_params(key, n_layers, D, H, dff):
    # PyTorch uses copy.deepcopy(decoder_layer): every layer starts from the SAME
    # weights; mirror that by reusing one layer's params for all layers.
    layer = init_layer_params(jax.random.fold_in(key, 0), D, dff)
    return {"n_heads": H, "layers": [layer for _ in range(n_layers)]}


# --------------------------------- main ------------------------------------

if __name__ == "__main__":
    B, St, Ss, D, H, dff, n_layers = 2, 8, 8, 32, 4, 64, 2

    key = jax.random.PRNGKey(0)
    k_x, k_enc, k_p = jax.random.split(key, 3)

    x = jax.random.normal(k_x, (B, St, D), jnp.float32)
    enc_out = jax.random.normal(k_enc, (B, Ss, D), jnp.float32)

    # decoder-side key padding (look-ahead/causal part is generated in-kernel)
    look_ahead_mask = jnp.zeros((B, St), jnp.float32)
    # cross-attention padding mask: mask out the last two encoder positions of batch 1
    mask = jnp.zeros((B, Ss), jnp.float32).at[1, -2:].set(-1e9)

    params = init_decoder_params(k_p, n_layers, D, H, dff)

    out = decoder_forward(params, x, enc_out, mask, look_ahead_mask)
    out = jax.block_until_ready(out)

    assert out.shape == (B, St, D)
    assert bool(jnp.all(jnp.isfinite(out)))
    print("KERNEL_OK")
</pallas_src>

<mosaic_0001>
module attributes {stable_mosaic.version = 11 : i64} {
  func.func @_linear_kernel(%arg0: i32, %arg1: memref<16x32xf32, #tpu.memory_space<vmem>>, %arg2: memref<32x96xbf16, #tpu.memory_space<vmem>>, %arg3: memref<1x96xf32, #tpu.memory_space<vmem>>, %arg4: memref<16x96xf32, #tpu.memory_space<vmem>>) attributes {dimension_semantics = [#tpu.dimension_semantics<parallel>], iteration_bounds = array<i64: 1>, scalar_prefetch = 0 : i64, scratch_operands = 0 : i64, tpu.core_type = #tpu.core_type<tc>, window_params = [{transform_indices = @transform_0, window_bounds = array<i64: 16, 32>}, {pipeline_mode = #tpu.pipeline_mode<synchronous>, transform_indices = @transform_1, window_bounds = array<i64: 32, 96>}, {pipeline_mode = #tpu.pipeline_mode<synchronous>, transform_indices = @transform_2, window_bounds = array<i64: 1, 96>}, {transform_indices = @transform_3, window_bounds = array<i64: 16, 96>}]} {
    %c0 = arith.constant 0 : index
    %c0_0 = arith.constant 0 : index
    %0 = vector.load %arg1[%c0, %c0_0] : memref<16x32xf32, #tpu.memory_space<vmem>>, vector<16x32xf32>
    %1 = arith.truncf %0 : vector<16x32xf32> to vector<16x32xbf16>
    %c0_1 = arith.constant 0 : index
    %c0_2 = arith.constant 0 : index
    %2 = vector.load %arg2[%c0_1, %c0_2] : memref<32x96xbf16, #tpu.memory_space<vmem>>, vector<32x96xbf16>
    %cst = arith.constant dense<0.000000e+00> : vector<16x96xf32>
    %3 = tpu.matmul %1, %2, %cst {dimension_numbers = #tpu.dot_dimension_numbers<[1], [0], [0], [1], [0, 0, 1, 1], [], []>} : vector<16x32xbf16>, vector<32x96xbf16>, vector<16x96xf32> -> vector<16x96xf32>
    %c0_3 = arith.constant 0 : index
    %c0_4 = arith.constant 0 : index
    %4 = vector.load %arg3[%c0_3, %c0_4] : memref<1x96xf32, #tpu.memory_space<vmem>>, vector<1x96xf32>
    %5 = vector.broadcast %4 : vector<1x96xf32> to vector<16x96xf32>
    %6 = arith.addf %3, %5 : vector<16x96xf32>
    %c0_5 = arith.constant 0 : index
    %c0_6 = arith.constant 0 : index
    %7 = vector.load %arg4[%c0_5, %c0_6] : memref<16x96xf32, #tpu.memory_space<vmem>>, vector<16x96xf32>
    tpu.vector_store %arg4[%c0_5, %c0_6], %6 {strides = array<i32>} : memref<16x96xf32, #tpu.memory_space<vmem>>, vector<16x96xf32>,
    return
  }
  func.func @transform_0(%arg0: i32) -> (i32, i32) {
    %c0_i32 = arith.constant 0 : i32
    %c0_i32_0 = arith.constant 0 : i32
    return %arg0, %c0_i32 : i32, i32
  }
  func.func @transform_1(%arg0: i32) -> (i32, i32) {
    %c0_i32 = arith.constant 0 : i32
    %c0_i32_0 = arith.constant 0 : i32
    %c0_i32_1 = arith.constant 0 : i32
    return %c0_i32, %c0_i32_0 : i32, i32
  }
  func.func @transform_2(%arg0: i32) -> (i32, i32) {
    %c0_i32 = arith.constant 0 : i32
    %c0_i32_0 = arith.constant 0 : i32
    %c0_i32_1 = arith.constant 0 : i32
    return %c0_i32, %c0_i32_0 : i32, i32
  }
  func.func @transform_3(%arg0: i32) -> (i32, i32) {
    %c0_i32 = arith.constant 0 : i32
    %c0_i32_0 = arith.constant 0 : i32
    return %arg0, %c0_i32 : i32, i32
  }
}

</mosaic_0001>

<bundles_post_ra>
// kernel: tpu_custom_call.1
= control target key start
LH: loop header
LB: loop body
LE: loop exit
PB: predicated region body
PF: predicated region fallthrough
CT: control target
= control target key end

     0   :  { %8 = vsyncpa [#allocation3], 0  ;;  %s275_s0 = inlined_call_operand.hbm [shape: f32[16,32], index: 0, kind: input, shape index: {}]   ;;  %s276_s1 = inlined_call_operand.hbm [shape: bf16[32,96], index: 1, kind: input, shape index: {}]   ;;  %s277_s2 = inlined_call_operand.vmem [shape: f32[1,96], index: 2, kind: input, shape index: {}]   ;;  %s278_s3 = inlined_call_operand.hbm [shape: f32[16,96], index: 3, kind: output, shape index: {}]  }
   0x1   :  { %9 = vsyncpa [#allocation6], 0 }
   0x2   :  { %10 = vsyncpa [#allocation4], 0  ;;  %s228_s12 = smov [#allocation2]  }
   0x3   :  { %s16_s13 = sshll.u32 %s228_s12, 4  ;;  %s17_s13 = int_to_ptr.vmem [resolvable:$true] %s16_s13 }
   0x4   :  { %s170_s14 = scalar_lea.vmem %s17_s13, 256  ;;  %p175_p1 = scmp.lt.s32.totalorder %s17_s13, %s17_s13 }
   0x5   :  { %p171_p0 = scmp.ne.s32.totalorder %s17_s13, %s170_s14  ;;  %p176_p2 = scmp.lt.s32.totalorder %s170_s14, %s170_s14 }
   0x7   :  { %p177_p3 = por %p176_p2, %p175_p1 }
   0x9   :  { %p178_p4 = pnand %p177_p3, %p171_p0 }
   0xb   :  { %181 = shalt.err (!%p178_p4)
}
   0xc   :  { %s229_s15 = smov 128   ;;  %s230_s16 = smov 8  }
   0xd   :  { %22 = dma.hbm_to_vmem [thread:$0]  %s275_s0, 256, %s17_s13, [#allocation3], %s229_s15, %s229_s15, %s230_s16  }
   0xe   :  { %s231_s19 = smov [#allocation5]  }
   0xf   :  { %s28_s20 = sshll.u32 %s231_s19, 4  ;;  %s29_s20 = int_to_ptr.vmem [resolvable:$true] %s28_s20 }
  0x10   :  { %s190_s21 = scalar_lea.vmem %s29_s20, 256  ;;  %p195_p6 = scmp.lt.s32.totalorder %s29_s20, %s29_s20 }
  0x11   :  { %p191_p5 = scmp.ne.s32.totalorder %s29_s20, %s190_s21  ;;  %p196_p7 = scmp.lt.s32.totalorder %s190_s21, %s190_s21 }
  0x13   :  { %p197_p8 = por %p196_p7, %p195_p6 }
  0x15   :  { %p198_p9 = pnand %p197_p8, %p191_p5 }
  0x17   :  { %201 = shalt.err (!%p198_p9)
}
  0x18   :  { %s232_s22 = smov 64   ;;  %s233_s23 = smov 4  }
  0x19   :  { %34 = dma.hbm_to_vmem [thread:$0]  %s276_s1, 256, %s29_s20, [#allocation6], %s232_s22, %s232_s22, %s233_s23  }
  0x1a   :  { %222 = dma.done.wait [#allocation3], 256  }
  0x1b   :  { %223 = vsyncadd [#allocation3], 4294967040 }
  0x1c   :  { %224 = dma.done.wait [#allocation6], 256  }
  0x1d   :  { %225 = vsyncadd [#allocation6], 4294967040  ;;  %v234_v0 = vmov 0.0   ;;  %vm235_vm0 = vmmov 0   ;;  %v160_v1 = vld [vmem:[#allocation5 + $0x8] sm:$0xff]   ;;  %v161_v2 = vld [vmem:[#allocation5] sm:$0xff]  }
  0x1e   :  { %143 = vmatprep.subr.bf16.mxu0 %v234_v0  ;;  %147 = vmatprep.mubr.msk.bf16.mxu0 %vm235_vm0, %v234_v0  ;;  %v44_v3 = vld [vmem:[#allocation2] sm:$0xff]  ;;  %v45_v4 = vld [vmem:[#allocation2 + $0x8] sm:$0xff]  ;;  %vm70_vm1 = vcmask 261120   ;;  %vm115_vm2 = vcmask 785408   ;;  %s236_s26 = smov [#allocation7]  }
  0x1f   :  { %144 = vmatpush3.bf16.msra.mxu0 %v160_v1  ;;  %v46_v5 = vpack.c.bf16 %v45_v4, %v44_v3  ;;  %v136_v6 = vld [vmem:[%s277_s2] ss:$0 sm:$0xff]  ;;  %s123_s27 = sshll.u32 %s236_s26, 4  ;;  %s124_s27 = int_to_ptr.vmem [resolvable:$true] %s123_s27 }
  0x20   :  { %145 = vmatprep.subr.bf16.mxu0 %v234_v0  ;;  %s202_s28 = scalar_lea.vmem %s124_s27, 256  ;;  %p207_p11 = scmp.lt.s32.totalorder %s124_s27, %s124_s27 }
  0x21   :  { %p203_p10 = scmp.ne.s32.totalorder %s124_s27, %s202_s28  ;;  %p208_p12 = scmp.lt.s32.totalorder %s202_s28, %s202_s28 }
  0x23   :  { %146 = vmatpush3.bf16.msra.mxu0 %v161_v2  ;;  %p209_p13 = por %p208_p12, %p207_p11 }
  0x25   :  { %p210_p0 = pnand %p209_p13, %p203_p10 }
  0x26   :  { %148 = vmatmul.mubr.msk.bf16.vlgmr.msra.gmra.mxu0 %vm70_vm1, %v46_v5 }
  0xe6   :  { %v108_v7 = vpop.f32.mrf.mxu0 }
  0xe7   :  { %v109_v8 = vadd.f32 %v136_v6, %v108_v7 }
  0xe8   :  { %v149_v9 = vpop.f32.mrf.mxu0 }
  0xe9   :  { %116 = vst.msk [vmem:[#allocation7] sm:$0xff] %vm115_vm2, %v109_v8 }
  0xea   :  { %v111_v10 = vpop.f32.mrf.mxu0 }
  0xeb   :  { %v112_v11 = vadd.f32 %v136_v6, %v111_v10 }
  0xec   :  { %v150_v12 = vpop.f32.mrf.mxu0 }
  0xed   :  { %117 = vst.msk [vmem:[#allocation7 + $0x8] sm:$0xff] %vm115_vm2, %v112_v11 }
  0xee   :  { %213 = shalt.err (!%p210_p0)
}
  0xef   :  { %129 = dma.vmem_to_hbm [thread:$0]  %s124_s27, 256, %s278_s3, [#allocation4], %s229_s15, %s229_s15, %s230_s16  }
  0xf0   :  { %226 = dma.done.wait [#allocation4], 256  }
  0xf1   :  { %227 = vsyncadd [#allocation4], 4294967040 }
  0xf2   :  { %133 = vsyncpa [#allocation3], 1 }
  0xf3   :  { %134 = vsyncpa [#allocation6], 1 }
  0xf4   :  { %135 = vsyncpa [#allocation4], 1 }

</bundles_post_ra>
